<compile_context>
chip_gen: v6e
topology: v6e:2x2x1
jax: 0.10.0
libtpu: 0.0.40
codegen_flags: <defaults>
</compile_context>

<pallas_src>
import jax
import jax.numpy as jnp
import numpy as np
from jax.experimental import pallas as pl
from jax.experimental.pallas import tpu as pltpu


def _attention_kernel(inp_ref, src_ref, bias_ref, w_in_t_ref,
                      w_out_ctx_t_ref, w_out_inp_t_ref, out_ref, attn_ref):
    inp = inp_ref[...]          # (TB, Din)
    src = src_ref[...]          # (TB, S, Dsrc)
    bias = bias_ref[...]        # (TB, S) additive mask bias (0 or -1e30)

    # Input half of the output projection: independent of the attention chain,
    # so the scheduler can overlap it with scores/softmax.          [MXU, M=TB]
    proj_inp = jnp.dot(inp, w_out_inp_t_ref[...],
                       preferred_element_type=jnp.float32)          # (TB, Dout)

    # x = input_proj(input)                                         [MXU, M=TB]
    x = jnp.dot(inp, w_in_t_ref[...],
                preferred_element_type=jnp.float32)                 # (TB, Dsrc)

    # scores[b, s] = <x[b], src[b, s]>  (batched contraction over Dsrc)
    scores = jnp.einsum(
        "bqd,bsd->bqs", x[:, None, :], src,
        preferred_element_type=jnp.float32)[:, 0, :]                # (TB, S)

    # Masked softmax over S (lane axis): additive bias instead of
    # compare+select with -inf.
    scores = scores + bias
    m = jnp.max(scores, axis=-1, keepdims=True)                     # (TB, 1)
    e = jnp.exp(scores - m)
    denom = jnp.sum(e, axis=-1, keepdims=True)
    attn = e * pl.reciprocal(denom, approx=False)   # exact: keeps 1e-5 parity
    attn_ref[...] = attn                            # sublane/lane-dense store

    # context[b] = sum_s attn[b, s] * src[b, s]
    ctx = jnp.einsum(
        "bqs,bsd->bqd", attn[:, None, :], src,
        preferred_element_type=jnp.float32)[:, 0, :]                # (TB, Dsrc)

    # out = tanh(ctx @ W_ctx + inp @ W_inp)  (split projection; no VMEM
    # concat scratch, no store->load RAW)                            [MXU, M=TB]
    out_ref[...] = jnp.tanh(
        jnp.dot(ctx, w_out_ctx_t_ref[...],
                preferred_element_type=jnp.float32) + proj_inp)


def prepare_attention_params(w_in, w_out):
    """Pre-transpose / split the PyTorch Linear weights ONCE (hoisted).

    w_in : (Dsrc, Din)        = input_proj.weight   (bias=False)
    w_out: (Dout, Dsrc + Din) = output_proj.weight  (bias=False); the first
           Dsrc columns act on the attention context, the rest on the input
           (cat order in the module is (ctx, input)).
    """
    w_in = jnp.asarray(w_in, jnp.float32)
    w_out = jnp.asarray(w_out, jnp.float32)
    dsrc = w_in.shape[0]
    w_in_t = w_in.T                       # (Din, Dsrc)
    w_out_ctx_t = w_out[:, :dsrc].T       # (Dsrc, Dout)
    w_out_inp_t = w_out[:, dsrc:].T       # (Din, Dout)
    return w_in_t, w_out_ctx_t, w_out_inp_t


def _pick_batch_tile(B, S, Dsrc, vmem_limit_bytes, itemsize=4):
    """Largest batch tile (<=256) whose double-buffered src block fits ~half
    the VMEM budget.  256 fills the v6e/v7x MXU M; 128 already fills v5e."""
    tb = 256
    while tb > 8 and 2 * tb * S * Dsrc * itemsize > vmem_limit_bytes // 2:
        tb //= 2
    if B <= tb:
        return B                     # single block equal to the full batch dim
    return max(8, (tb // 8) * 8)     # keep 2-D block sublane dim a multiple of 8


def attention_layer(inp, source_hids, encoder_padding_mask,
                    w_in_t, w_out_ctx_t, w_out_inp_t,
                    *, batch_tile=None, vmem_limit_bytes=48 * 1024 * 1024):
    """Forward pass matching fairseq AttentionLayer.

    inp                  : (B, Din)
    source_hids          : (S, B, Dsrc)    (PyTorch layout)
    encoder_padding_mask : (S, B) bool/float (truthy = padded) or None
    weights              : outputs of prepare_attention_params
    Returns (out (B, Dout), attn_scores (S, B)).
    """
    B, Din = inp.shape
    S, _, Dsrc = source_hids.shape
    Dout = w_out_ctx_t.shape[1]

    tb = batch_tile or _pick_batch_tile(B, S, Dsrc, vmem_limit_bytes)
    grid_b = pl.cdiv(B, tb)

    # Re-layout so S / Dsrc sit on the lane axis inside the kernel.
    # (Kept for PyTorch-layout compatibility; drop if the surrounding model
    # can produce/consume batch-major tensors directly.)
    src_bsd = jnp.transpose(source_hids, (1, 0, 2))                  # (B, S, Dsrc)
    if encoder_padding_mask is None:
        bias_bs = jnp.zeros((B, S), jnp.float32)
    else:
        bias_bs = jnp.where(jnp.asarray(encoder_padding_mask, bool).T,
                            jnp.float32(-1e30), jnp.float32(0.0))    # (B, S)

    out, attn_bs = pl.pallas_call(
        _attention_kernel,
        out_shape=(
            jax.ShapeDtypeStruct((B, Dout), jnp.float32),
            jax.ShapeDtypeStruct((B, S), jnp.float32),
        ),
        grid=(grid_b,),
        in_specs=[
            pl.BlockSpec((tb, Din), lambda b: (b, 0)),
            pl.BlockSpec((tb, S, Dsrc), lambda b: (b, 0, 0)),
            pl.BlockSpec((tb, S), lambda b: (b, 0)),
            # Constant-index weight blocks (resident across grid steps).
            pl.BlockSpec((Din, Dsrc), lambda b: (0, 0)),
            pl.BlockSpec((Dsrc, Dout), lambda b: (0, 0)),
            pl.BlockSpec((Din, Dout), lambda b: (0, 0)),
        ],
        out_specs=(
            pl.BlockSpec((tb, Dout), lambda b: (b, 0)),
            pl.BlockSpec((tb, S), lambda b: (b, 0)),
        ),
        compiler_params=pltpu.CompilerParams(
            dimension_semantics=("parallel",),
            vmem_limit_bytes=vmem_limit_bytes,
        ),
    )(inp, src_bsd, bias_bs, w_in_t, w_out_ctx_t, w_out_inp_t)

    attn_sb = jnp.transpose(attn_bs, (1, 0))   # back to PyTorch (S, B) layout
    return out, attn_sb


def reference_forward(inp, source_hids, padding_mask_bool, w_in, w_out):
    """Pure-JAX reference matching the PyTorch module."""
    x = inp @ w_in.T
    scores = jnp.sum(source_hids * x[None, :, :], axis=2)
    if padding_mask_bool is not None:
        scores = jnp.where(padding_mask_bool, -jnp.inf, scores)
    attn = jax.nn.softmax(scores, axis=0)
    ctx = jnp.sum(attn[:, :, None] * source_hids, axis=0)
    cat = jnp.concatenate([ctx, inp], axis=1)
    out = jnp.tanh(cat @ w_out.T)
    return out, attn


if __name__ == "__main__":
    B, S = 2, 8
    Din, Dsrc, Dout = 32, 32, 32

    key = jax.random.PRNGKey(0)
    k1, k2, k3, k4 = jax.random.split(key, 4)

    inp = jax.random.normal(k1, (B, Din), dtype=jnp.float32)
    source_hids = jax.random.normal(k2, (S, B, Dsrc), dtype=jnp.float32)

    # Deterministic weight init mimicking uniform_(-0.1, 0.1); bias=False.
    w_in = jax.random.uniform(k3, (Dsrc, Din), minval=-0.1, maxval=0.1,
                              dtype=jnp.float32)
    w_out = jax.random.uniform(k4, (Dout, Dsrc + Din), minval=-0.1, maxval=0.1,
                               dtype=jnp.float32)

    # Encoder padding mask: last 3 source positions of batch element 1 padded.
    mask_np = np.zeros((S, B), dtype=bool)
    mask_np[S - 3:, 1] = True
    mask_bool = jnp.asarray(mask_np)

    w_in_t, w_out_ctx_t, w_out_inp_t = prepare_attention_params(w_in, w_out)

    out, attn = attention_layer(inp, source_hids, mask_bool,
                                w_in_t, w_out_ctx_t, w_out_inp_t)
    out = jax.block_until_ready(out)
    attn = jax.block_until_ready(attn)

    out_ref, attn_ref = reference_forward(inp, source_hids, mask_bool, w_in, w_out)

    assert np.allclose(np.asarray(out), np.asarray(out_ref), atol=1e-5, rtol=1e-5)
    assert np.allclose(np.asarray(attn), np.asarray(attn_ref), atol=1e-5, rtol=1e-5)

    print("KERNEL_OK")
</pallas_src>

<mosaic_0001>
module attributes {stable_mosaic.version = 11 : i64} {
  func.func @_attention_kernel(%arg0: i32, %arg1: memref<2x32xf32, #tpu.memory_space<vmem>>, %arg2: memref<2x8x32xf32, #tpu.memory_space<vmem>>, %arg3: memref<2x8xf32, #tpu.memory_space<vmem>>, %arg4: memref<32x32xf32, #tpu.memory_space<vmem>>, %arg5: memref<32x32xf32, #tpu.memory_space<vmem>>, %arg6: memref<32x32xf32, #tpu.memory_space<vmem>>, %arg7: memref<2x32xf32, #tpu.memory_space<vmem>>, %arg8: memref<2x8xf32, #tpu.memory_space<vmem>>) attributes {dimension_semantics = [#tpu.dimension_semantics<parallel>], iteration_bounds = array<i64: 1>, scalar_prefetch = 0 : i64, scratch_operands = 0 : i64, tpu.core_type = #tpu.core_type<tc>, window_params = [{transform_indices = @transform_0, window_bounds = array<i64: 2, 32>}, {transform_indices = @transform_1, window_bounds = array<i64: 2, 8, 32>}, {transform_indices = @transform_2, window_bounds = array<i64: 2, 8>}, {pipeline_mode = #tpu.pipeline_mode<synchronous>, transform_indices = @transform_3, window_bounds = array<i64: 32, 32>}, {pipeline_mode = #tpu.pipeline_mode<synchronous>, transform_indices = @transform_4, window_bounds = array<i64: 32, 32>}, {pipeline_mode = #tpu.pipeline_mode<synchronous>, transform_indices = @transform_5, window_bounds = array<i64: 32, 32>}, {transform_indices = @transform_6, window_bounds = array<i64: 2, 32>}, {transform_indices = @transform_7, window_bounds = array<i64: 2, 8>}]} {
    %c0 = arith.constant 0 : index
    %c0_0 = arith.constant 0 : index
    %0 = vector.load %arg1[%c0, %c0_0] : memref<2x32xf32, #tpu.memory_space<vmem>>, vector<2x32xf32>
    %c0_1 = arith.constant 0 : index
    %c0_2 = arith.constant 0 : index
    %c0_3 = arith.constant 0 : index
    %1 = vector.load %arg2[%c0_1, %c0_2, %c0_3] : memref<2x8x32xf32, #tpu.memory_space<vmem>>, vector<2x8x32xf32>
    %c0_4 = arith.constant 0 : index
    %c0_5 = arith.constant 0 : index
    %2 = vector.load %arg3[%c0_4, %c0_5] : memref<2x8xf32, #tpu.memory_space<vmem>>, vector<2x8xf32>
    %c0_6 = arith.constant 0 : index
    %c0_7 = arith.constant 0 : index
    %3 = vector.load %arg6[%c0_6, %c0_7] : memref<32x32xf32, #tpu.memory_space<vmem>>, vector<32x32xf32>
    %cst = arith.constant dense<0.000000e+00> : vector<2x32xf32>
    %4 = tpu.matmul %0, %3, %cst {dimension_numbers = #tpu.dot_dimension_numbers<[1], [0], [0], [1], [0, 0, 1, 1], [], []>} : vector<2x32xf32>, vector<32x32xf32>, vector<2x32xf32> -> vector<2x32xf32>
    %c0_8 = arith.constant 0 : index
    %c0_9 = arith.constant 0 : index
    %5 = vector.load %arg4[%c0_8, %c0_9] : memref<32x32xf32, #tpu.memory_space<vmem>>, vector<32x32xf32>
    %cst_10 = arith.constant dense<0.000000e+00> : vector<2x32xf32>
    %6 = tpu.matmul %0, %5, %cst_10 {dimension_numbers = #tpu.dot_dimension_numbers<[1], [0], [0], [1], [0, 0, 1, 1], [], []>} : vector<2x32xf32>, vector<32x32xf32>, vector<2x32xf32> -> vector<2x32xf32>
    %7 = vector.shape_cast %6 : vector<2x32xf32> to vector<2x1x32xf32>
    "tpu.trace_start"() <{level = 10 : i32, message = "bqd,bsd->bqs"}> : () -> ()
    %cst_11 = arith.constant dense<0.000000e+00> : vector<2x1x8xf32>
    %8 = tpu.matmul %7, %1, %cst_11 {dimension_numbers = #tpu.dot_dimension_numbers<[2], [2], [1], [1], [0, 0, 0, 1, 1, 1], [0], [0]>} : vector<2x1x32xf32>, vector<2x8x32xf32>, vector<2x1x8xf32> -> vector<2x1x8xf32>
    "tpu.trace_stop"() : () -> ()
    %9 = vector.shape_cast %8 : vector<2x1x8xf32> to vector<2x8xf32>
    %10 = arith.addf %9, %2 : vector<2x8xf32>
    %cst_12 = arith.constant dense<0xFF800000> : vector<2xf32>
    %11 = vector.multi_reduction <maximumf>, %10, %cst_12 [1] : vector<2x8xf32> to vector<2xf32>
    %12 = vector.shape_cast %11 : vector<2xf32> to vector<2x1xf32>
    %13 = vector.broadcast %12 : vector<2x1xf32> to vector<2x8xf32>
    %14 = arith.subf %10, %13 : vector<2x8xf32>
    %15 = math.exp %14 : vector<2x8xf32>
    %cst_13 = arith.constant dense<0.000000e+00> : vector<2xf32>
    %16 = vector.multi_reduction <add>, %15, %cst_13 [1] : vector<2x8xf32> to vector<2xf32>
    %17 = vector.shape_cast %16 : vector<2xf32> to vector<2x1xf32>
    %18 = tpu.reciprocal %17 : vector<2x1xf32> -> vector<2x1xf32>
    %19 = vector.broadcast %18 : vector<2x1xf32> to vector<2x8xf32>
    %20 = arith.mulf %15, %19 : vector<2x8xf32>
    %c0_14 = arith.constant 0 : index
    %c0_15 = arith.constant 0 : index
    %21 = vector.load %arg8[%c0_14, %c0_15] : memref<2x8xf32, #tpu.memory_space<vmem>>, vector<2x8xf32>
    tpu.vector_store %arg8[%c0_14, %c0_15], %20 {strides = array<i32>} : memref<2x8xf32, #tpu.memory_space<vmem>>, vector<2x8xf32>,
    %22 = vector.shape_cast %20 : vector<2x8xf32> to vector<2x1x8xf32>
    "tpu.trace_start"() <{level = 10 : i32, message = "bqs,bsd->bqd"}> : () -> ()
    %cst_16 = arith.constant dense<0.000000e+00> : vector<2x1x32xf32>
    %23 = tpu.matmul %22, %1, %cst_16 {dimension_numbers = #tpu.dot_dimension_numbers<[2], [1], [1], [2], [0, 0, 0, 1, 1, 2], [0], [0]>} : vector<2x1x8xf32>, vector<2x8x32xf32>, vector<2x1x32xf32> -> vector<2x1x32xf32>
    "tpu.trace_stop"() : () -> ()
    %24 = vector.shape_cast %23 : vector<2x1x32xf32> to vector<2x32xf32>
    %c0_17 = arith.constant 0 : index
    %c0_18 = arith.constant 0 : index
    %25 = vector.load %arg5[%c0_17, %c0_18] : memref<32x32xf32, #tpu.memory_space<vmem>>, vector<32x32xf32>
    %cst_19 = arith.constant dense<0.000000e+00> : vector<2x32xf32>
    %26 = tpu.matmul %24, %25, %cst_19 {dimension_numbers = #tpu.dot_dimension_numbers<[1], [0], [0], [1], [0, 0, 1, 1], [], []>} : vector<2x32xf32>, vector<32x32xf32>, vector<2x32xf32> -> vector<2x32xf32>
    %27 = arith.addf %26, %4 : vector<2x32xf32>
    %28 = math.tanh %27 : vector<2x32xf32>
    %c0_20 = arith.constant 0 : index
    %c0_21 = arith.constant 0 : index
    %29 = vector.load %arg7[%c0_20, %c0_21] : memref<2x32xf32, #tpu.memory_space<vmem>>, vector<2x32xf32>
    tpu.vector_store %arg7[%c0_20, %c0_21], %28 {strides = array<i32>} : memref<2x32xf32, #tpu.memory_space<vmem>>, vector<2x32xf32>,
    return
  }
  func.func @transform_0(%arg0: i32) -> (i32, i32) {
    %c0_i32 = arith.constant 0 : i32
    %c0_i32_0 = arith.constant 0 : i32
    return %arg0, %c0_i32 : i32, i32
  }
  func.func @transform_1(%arg0: i32) -> (i32, i32, i32) {
    %c0_i32 = arith.constant 0 : i32
    %c0_i32_0 = arith.constant 0 : i32
    %c0_i32_1 = arith.constant 0 : i32
    return %arg0, %c0_i32, %c0_i32_0 : i32, i32, i32
  }
  func.func @transform_2(%arg0: i32) -> (i32, i32) {
    %c0_i32 = arith.constant 0 : i32
    %c0_i32_0 = arith.constant 0 : i32
    return %arg0, %c0_i32 : i32, i32
  }
  func.func @transform_3(%arg0: i32) -> (i32, i32) {
    %c0_i32 = arith.constant 0 : i32
    %c0_i32_0 = arith.constant 0 : i32
    %c0_i32_1 = arith.constant 0 : i32
    return %c0_i32, %c0_i32_0 : i32, i32
  }
  func.func @transform_4(%arg0: i32) -> (i32, i32) {
    %c0_i32 = arith.constant 0 : i32
    %c0_i32_0 = arith.constant 0 : i32
    %c0_i32_1 = arith.constant 0 : i32
    return %c0_i32, %c0_i32_0 : i32, i32
  }
  func.func @transform_5(%arg0: i32) -> (i32, i32) {
    %c0_i32 = arith.constant 0 : i32
    %c0_i32_0 = arith.constant 0 : i32
    %c0_i32_1 = arith.constant 0 : i32
    return %c0_i32, %c0_i32_0 : i32, i32
  }
  func.func @transform_6(%arg0: i32) -> (i32, i32) {
    %c0_i32 = arith.constant 0 : i32
    %c0_i32_0 = arith.constant 0 : i32
    return %arg0, %c0_i32 : i32, i32
  }
  func.func @transform_7(%arg0: i32) -> (i32, i32) {
    %c0_i32 = arith.constant 0 : i32
    %c0_i32_0 = arith.constant 0 : i32
    return %arg0, %c0_i32 : i32, i32
  }
}

</mosaic_0001>

<bundles_post_ra>
// kernel: tpu_custom_call.1
= control target key start
LH: loop header
LB: loop body
LE: loop exit
PB: predicated region body
PF: predicated region fallthrough
CT: control target
= control target key end

     0   :  { %13 = vsyncpa [#allocation3], 0  ;;  %s1123_s0 = inlined_call_operand.hbm [shape: f32[2,32], index: 0, kind: input, shape index: {}]   ;;  %s1124_s1 = inlined_call_operand.hbm [shape: f32[2,8,32], index: 1, kind: input, shape index: {}]   ;;  %s1125_s2 = inlined_call_operand.vmem [shape: f32[2,8], index: 2, kind: input, shape index: {}]   ;;  %s1126_s3 = inlined_call_operand.hbm [shape: f32[32,32], index: 3, kind: input, shape index: {}]   ;;  %s1127_s4 = inlined_call_operand.hbm [shape: f32[32,32], index: 4, kind: input, shape index: {}]   ;;  %s1128_s5 = inlined_call_operand.hbm [shape: f32[32,32], index: 5, kind: input, shape index: {}]   ;;  %s1129_s6 = inlined_call_operand.hbm [shape: f32[2,32], index: 6, kind: output, shape index: {0}]   ;;  %s1130_s7 = inlined_call_operand.hbm [shape: f32[2,8], index: 7, kind: output, shape index: {1}]  }
   0x1   :  { %14 = vsyncpa [#allocation6], 0 }
   0x2   :  { %15 = vsyncpa [#allocation9], 0 }
   0x3   :  { %16 = vsyncpa [#allocation4], 0 }
   0x4   :  { %17 = vsyncpa [#allocation13], 0  ;;  %s983_s24 = smov [#allocation5]  }
   0x5   :  { %s33_s25 = sshll.u32 %s983_s24, 4  ;;  %s34_s25 = int_to_ptr.vmem [resolvable:$true] %s33_s25 }
   0x6   :  { %s841_s26 = scalar_lea.vmem %s34_s25, 256  ;;  %p846_p1 = scmp.lt.s32.totalorder %s34_s25, %s34_s25 }
   0x7   :  { %p842_p0 = scmp.ne.s32.totalorder %s34_s25, %s841_s26  ;;  %p847_p2 = scmp.lt.s32.totalorder %s841_s26, %s841_s26 }
   0x9   :  { %p848_p3 = por %p847_p2, %p846_p1 }
   0xb   :  { %p849_p4 = pnand %p848_p3, %p842_p0 }
   0xd   :  { %852 = shalt.err (!%p849_p4)
}
   0xe   :  { %s984_s27 = smov 128   ;;  %s985_s28 = smov 8  }
   0xf   :  { %39 = dma.hbm_to_vmem [thread:$0]  %s1124_s1, 256, %s34_s25, [#allocation6], %s984_s27, %s984_s27, %s985_s28  }
  0x10   :  { %s986_s8 = smov [#allocation8]   ;;  %s987_s10 = smov [#allocation2]  }
  0x11   :  { %s59_s9 = sshll.u32 %s986_s8, 4  ;;  %s24_s11 = sshll.u32 %s987_s10, 4  ;;  %s60_s9 = int_to_ptr.vmem [resolvable:$true] %s59_s9  ;;  %s25_s11 = int_to_ptr.vmem [resolvable:$true] %s24_s11 }
  0x12   :  { %s861_s12 = scalar_lea.vmem %s60_s9, 512  ;;  %p866_p6 = scmp.lt.s32.totalorder %s60_s9, %s60_s9 }
  0x13   :  { %p862_p5 = scmp.ne.s32.totalorder %s60_s9, %s861_s12  ;;  %p867_p7 = scmp.lt.s32.totalorder %s861_s12, %s861_s12 }
  0x15   :  { %p868_p8 = por %p867_p7, %p866_p6 }
  0x17   :  { %p869_p9 = pnand %p868_p8, %p862_p5 }
  0x19   :  { %872 = shalt.err (!%p869_p9)
}
  0x1a   :  { %65 = dma.hbm_to_vmem [thread:$0]  %s1127_s4, 512, %s60_s9, [#allocation9], %s984_s27, %s984_s27, %s985_s28  }
  0x1b   :  { %s881_s1 = scalar_lea.vmem %s25_s11, 32  ;;  %p886_p11 = scmp.lt.s32.totalorder %s25_s11, %s25_s11 }
  0x1c   :  { %p882_p10 = scmp.ne.s32.totalorder %s25_s11, %s881_s1  ;;  %p887_p12 = scmp.lt.s32.totalorder %s881_s1, %s881_s1 }
  0x1e   :  { %p888_p13 = por %p887_p12, %p886_p11 }
  0x20   :  { %p889_p0 = pnand %p888_p13, %p882_p10 }
  0x22   :  { %892 = shalt.err (!%p889_p0)
}
  0x23   :  { %27 = dma.hbm_to_vmem [thread:$0]  %s1123_s0, 32, %s25_s11, [#allocation3]  }
  0x24   :  { %s988_s17 = smov [#allocation7]   ;;  %s989_s19 = smov [#allocation10]  }
  0x25   :  { %s47_s18 = sshll.u32 %s988_s17, 4  ;;  %s71_s20 = sshll.u32 %s989_s19, 4  ;;  %s48_s18 = int_to_ptr.vmem [resolvable:$true] %s47_s18  ;;  %s72_s20 = int_to_ptr.vmem [resolvable:$true] %s71_s20 }
  0x26   :  { %s901_s21 = scalar_lea.vmem %s48_s18, 512  ;;  %p906_p2 = scmp.lt.s32.totalorder %s48_s18, %s48_s18 }
  0x27   :  { %p902_p1 = scmp.ne.s32.totalorder %s48_s18, %s901_s21  ;;  %p907_p3 = scmp.lt.s32.totalorder %s901_s21, %s901_s21 }
  0x29   :  { %p908_p4 = por %p907_p3, %p906_p2 }
  0x2b   :  { %p909_p5 = pnand %p908_p4, %p902_p1 }
  0x2d   :  { %912 = shalt.err (!%p909_p5)
}
  0x2e   :  { %53 = dma.hbm_to_vmem [thread:$0]  %s1126_s3, 512, %s48_s18, [#allocation6], %s984_s27, %s984_s27, %s985_s28  }
  0x2f   :  { %s921_s0 = scalar_lea.vmem %s72_s20, 512  ;;  %p926_p7 = scmp.lt.s32.totalorder %s72_s20, %s72_s20 }
  0x30   :  { %p922_p6 = scmp.ne.s32.totalorder %s72_s20, %s921_s0  ;;  %p927_p8 = scmp.lt.s32.totalorder %s921_s0, %s921_s0 }
  0x32   :  { %p928_p9 = por %p927_p8, %p926_p7 }
  0x34   :  { %p929_p10 = pnand %p928_p9, %p922_p6 }
  0x36   :  { %932 = shalt.err (!%p929_p10)
}
  0x37   :  { %77 = dma.hbm_to_vmem [thread:$0]  %s1128_s5, 512, %s72_s20, [#allocation9], %s984_s27, %s984_s27, %s985_s28  }
  0x38   :  { %973 = dma.done.wait [#allocation3], 32  }
  0x39   :  { %974 = vsyncadd [#allocation3], 4294967264 }
  0x3a   :  { %975 = dma.done.wait [#allocation6], 768  }
  0x3b   :  { %976 = vsyncadd [#allocation6], 4294966528 }
  0x3c   :  { %977 = dma.done.wait [#allocation9], 1024  }
  0x3d   :  { %978 = vsyncadd [#allocation9], 4294966272  ;;  %v990_v0 = vmov 0.0   ;;  %vm991_vm0 = vmmov 0   ;;  %v178_v1 = vld [vmem:[#allocation7 + $0x18] sm:$0xff]  ;;  %v177_v2 = vld [vmem:[#allocation7 + $0x10] sm:$0xff]  ;;  %v253_v9 = vlaneseq }
  0x3e   :  { %771 = vmatprep.subr.mxu1 %v990_v0  ;;  %779 = vmatprep.mubr.msk.f32.mxu1 %vm991_vm0, %v990_v0  ;;  %v176_v3 = vld [vmem:[#allocation7 + $0x8] sm:$0xff]  ;;  %v175_v4 = vld [vmem:[#allocation7] sm:$0xff]  ;;  %vm101_vm1 = vcmask 261120   ;;  %v1078_v6 = vld [vmem:[#allocation5] sm:$0xff]  ;;  %v992_v7 = vmov 1966171168  }
  0x3f   :  { %760 = vmatprep.subr.mxu0 %v990_v0  ;;  %768 = vmatprep.mubr.msk.f32.mxu0 %vm991_vm0, %v990_v0  ;;  %v1070_v5 = vld [vmem:[#allocation2] sm:$0x3]  ;;  %v251_v8 = vunpack.c.l.s4 %v992_v7  ;;  %v254_v11 = vshrl.u32 %v253_v9, 7  ;;  %v95_v18 = vld [vmem:[#allocation5 + $0x8] sm:$0xff]  ;;  %vm431_vm2 = vcmask 1041409   ;;  %vm434_vm3 = vcmask 58368  }
  0x40   :  { %772 = vmatpush3.msra.mxu1 %v178_v1  ;;  %v96_v20 = vld [vmem:[%s1125_s2] sm:$0x3]  ;;  %v100_v42 = vld [vmem:[#allocation10 + $0x18] sm:$0xff]  ;;  %v99_v43 = vld [vmem:[#allocation10 + $0x10] sm:$0xff]  ;;  %vm469_vm4 = vcmask 64512   ;;  %s993_s2 = smov [#allocation12]  }
  0x41   :  { %773 = vmatprep.subr.mxu1 %v990_v0  ;;  %v252_v10 = vunpack.c.0.s8 %v251_v8  ;;  %v423_v22 = vrot.slane %v96_v20, 1  ;;  %761 = vmatpush3.msra.mxu0 %v100_v42  ;;  %v98_v44 = vld [vmem:[#allocation10 + $0x8] sm:$0xff]  ;;  %v97_v45 = vld [vmem:[#allocation10] sm:$0xff]  ;;  %v617_v50 = vld [vmem:[#allocation8 + $0x18] sm:$0xff]  ;;  %s713_s25 = sshll.u32 %s993_s2, 4  ;;  %s714_s25 = int_to_ptr.vmem [resolvable:$true] %s713_s25 }
  0x42   :  { %774 = vmatpush3.msra.mxu1 %v177_v2  ;;  %762 = vmatprep.subr.mxu0 %v990_v0  ;;  %v616_v56 = vld [vmem:[#allocation8 + $0x10] sm:$0xff]  ;;  %v615_v57 = vld [vmem:[#allocation8 + $0x8] sm:$0xff]  ;;  %v614_v58 = vld [vmem:[#allocation8] sm:$0xff]  ;;  %s933_s26 = scalar_lea.vmem %s714_s25, 32  ;;  %p938_p12 = scmp.lt.s32.totalorder %s714_s25, %s714_s25 }
  0x43   :  { %775 = vmatprep.subr.mxu1 %v990_v0  ;;  %v255_v12 = vsub.s32 %v252_v10, %v254_v11  ;;  %763 = vmatpush3.msra.mxu0 %v99_v43  ;;  %p934_p11 = scmp.ne.s32.totalorder %s714_s25, %s933_s26  ;;  %p939_p13 = scmp.lt.s32.totalorder %s933_s26, %s933_s26 }
  0x44   :  { %776 = vmatpush3.msra.mxu1 %v176_v3  ;;  %764 = vmatprep.subr.mxu0 %v990_v0 }
  0x45   :  { %777 = vmatprep.subr.mxu1 %v990_v0  ;;  %765 = vmatpush3.msra.mxu0 %v98_v44  ;;  %p940_p0 = por %p939_p13, %p938_p12 }
  0x46   :  { %778 = vmatpush3.msra.mxu1 %v175_v4  ;;  %766 = vmatprep.subr.mxu0 %v990_v0 }
  0x47   :  { %780 = vmatmul.mubr.msk.f32.vlgmr.msra.gmra.mxu1 %vm101_vm1, %v1070_v5  ;;  %782 = vmatprep.subr.mxu1 %v990_v0  ;;  %p941_p1 = pnand %p940_p0, %p934_p11 }
  0x48   :  { %784 = vmatprep.mubr.msk.f32.mxu1 %vm991_vm0, %v990_v0  ;;  %783 = vmatpush3.xpose.msk.msra.mxu1 %vm101_vm1, %v1078_v6 }
  0x49   :  { %787 = vmatprep.subr.mxu1 %v990_v0  ;;  %767 = vmatpush3.msra.mxu0 %v97_v45 }
  0x4a   :  { %769 = vmatmul.mubr.msk.f32.vlgmr.msra.gmra.mxu0 %vm101_vm1, %v1070_v5  ;;  %792 = vmatprep.subr.mxu0 %v990_v0 }
  0x4b   :  { %793 = vmatpush3.msra.mxu0 %v1078_v6  ;;  %794 = vmatprep.mubr.msk.f32.mxu0 %vm991_vm0, %v990_v0 }
  0x4c   :  { %802 = vmatprep.subr.mxu0 %v990_v0 }
 0x107   :  { %v245_v13 = vpop.f32.mrf.mxu1 }
 0x108   :  { %v256_v14 = vrot.slane %v245_v13, %v255_v12 }
 0x109   :  { %v781_v15 = vpop.f32.mrf.mxu1 }
 0x10a   :  { %v257_v16 = vcombine.high %v256_v14, %v256_v14  ;;  %v264_v17 = vrot.slane %v256_v14, %v255_v12  ;;  %v171_v54 = vpop.f32.mrf.mxu0 }
 0x10c   :  { %785 = vmatmul.mubr.msk.f32.vlgmr.msra.gmra.mxu1 %vm101_vm1, %v264_v17  ;;  %v271_v19 = vrot.slane %v257_v16, %v255_v12  ;;  %v770_v55 = vpop.f32.mrf.mxu0 }
 0x10d   :  { %788 = vmatpush3.xpose.msk.msra.mxu1 %vm101_vm1, %v95_v18  ;;  %789 = vmatprep.mubr.msk.f32.mxu1 %vm991_vm0, %v990_v0 }
 0x10e   :  { %797 = vmatprep.subr.mxu1 %v990_v0 }
 0x110   :  { %790 = vmatmul.mubr.msk.f32.vlgmr.msra.gmra.mxu1 %vm101_vm1, %v271_v19 }
 0x111   :  { %798 = vmatpush3.msra.mxu1 %v95_v18  ;;  %799 = vmatprep.mubr.msk.f32.mxu1 %vm991_vm0, %v990_v0 }
 0x1cc   :  { %v343_v21 = vpop.f32.mrf.mxu1 }
 0x1cd   :  { %v426_v27 = vadd.f32 %v343_v21, %v96_v20 }
 0x1ce   :  { %v786_v23 = vpop.f32.mrf.mxu1 }
 0x1d0   :  { %v418_v24 = vpop.f32.mrf.mxu1 }
 0x1d1   :  { %v427_v25 = vadd.f32 %v423_v22, %v418_v24 }
 0x1d2   :  { %v791_v26 = vpop.f32.mrf.mxu1 }
 0x1d3   :  { %v430_v28 = vrot.slane %v427_v25, 7 }
 0x1d5   :  { %v432_v29 = vsel %vm431_vm2, %v430_v28, %v426_v27 }
 0x1d6   :  { %v435_v30 = vsel %vm434_vm3, %v432_v29, -inf }
 0x1d7   :  { %436 = vmax.xlane.f32.xlu0 %v435_v30 }
 0x260   :  { %v437_v31 = vpop.xlane.xlu0 %436 }
 0x261   :  { %v439_v32 = vrot.slane %v437_v31, 1  ;;  %v442_v33 = vsub.f32 %v426_v27, %v437_v31 }
 0x263   :  { %v443_v34 = vsub.f32 %v427_v25, %v439_v32  ;;  %v444_v35 = vmul.f32 1.442695, %v442_v33 }
 0x265   :  { %v446_v36 = vmul.f32 1.442695, %v443_v34 }
 0x267   :  { %825 = vpow2.f32 %v446_v36 }
 0x268   :  { %827 = vpow2.f32 %v444_v35 }
 0x274   :  { %v826_v37 = vpop.eup %825 }
 0x275   :  { %v450_v38 = vrot.slane %v826_v37, 7  ;;  %v828_v39 = vpop.eup %827 }
 0x277   :  { %v451_v40 = vsel %vm431_vm2, %v450_v38, %v828_v39 }
 0x278   :  { %v453_v41 = vsel %vm434_vm3, %v451_v40, 0.0 }
 0x279   :  { %454 = vadd.xlane.f32.xlu0 %v453_v41 }
 0x302   :  { %v455_v46 = vpop.xlane.xlu0 %454 }
 0x303   :  { %829 = vrcp.f32 %v455_v46 }
 0x310   :  { %v830_v47 = vpop.eup %829 }
 0x311   :  { %v458_v48 = vrot.slane %v830_v47, 1  ;;  %v461_v49 = vmul.f32 %v830_v47, %v828_v39 }
 0x313   :  { %795 = vmatmul.mubr.msk.f32.vlgmr.msra.gmra.mxu0 %vm469_vm4, %v461_v49  ;;  %v462_v51 = vmul.f32 %v826_v37, %v458_v48 }
 0x314   :  { %803 = vmatpush3.msra.mxu0 %v617_v50  ;;  %810 = vmatprep.mubr.msk.f32.mxu0 %vm991_vm0, %v990_v0 }
 0x315   :  { %800 = vmatmul.mubr.msk.f32.vlgmr.msra.gmra.mxu1 %vm469_vm4, %v462_v51  ;;  %804 = vmatprep.subr.mxu0 %v990_v0  ;;  %v465_v52 = vrot.slane %v462_v51, 7 }
 0x316   :  { %805 = vmatpush3.msra.mxu0 %v616_v56 }
 0x317   :  { %v466_v53 = vsel %vm431_vm2, %v465_v52, %v461_v49  ;;  %806 = vmatprep.subr.mxu0 %v990_v0 }
 0x318   :  { %468 = vst.msk [vmem:[#allocation12] sm:$0x3] %vm434_vm3, %v466_v53  ;;  %807 = vmatpush3.msra.mxu0 %v615_v57 }
 0x319   :  { %808 = vmatprep.subr.mxu0 %v990_v0 }
 0x31a   :  { %809 = vmatpush3.msra.mxu0 %v614_v58 }
 0x3d3   :  { %v538_v59 = vpop.f32.mrf.mxu0 }
 0x3d5   :  { %v796_v60 = vpop.f32.mrf.mxu0  ;;  %v610_v61 = vpop.f32.mrf.mxu1 }
 0x3d6   :  { %v620_v62 = vrot.slane %v610_v61, 7 }
 0x3d7   :  { %v801_v63 = vpop.f32.mrf.mxu1 }
 0x3d8   :  { %v621_v1 = vsel %vm431_vm2, %v620_v62, %v538_v59 }
 0x3d9   :  { %811 = vmatmul.mubr.msk.f32.vlgmr.msra.gmra.mxu0 %vm101_vm1, %v621_v1 }
 0x3da   :  { %944 = shalt.err (!%p941_p1)
}
 0x3db   :  { %716 = dma.vmem_to_hbm [thread:$0]  %s714_s25, 32, %s1130_s7, [#allocation13]   ;;  %vm695_vm5 = vcmask 254976  }
 0x3dc   :  { %s994_s29 = smov [#allocation11]  }
 0x3dd   :  { %s703_s30 = sshll.u32 %s994_s29, 4  ;;  %s704_s30 = int_to_ptr.vmem [resolvable:$true] %s703_s30 }
 0x3de   :  { %s953_s8 = scalar_lea.vmem %s704_s30, 32  ;;  %p958_p3 = scmp.lt.s32.totalorder %s704_s30, %s704_s30 }
 0x3df   :  { %p954_p2 = scmp.ne.s32.totalorder %s704_s30, %s953_s8  ;;  %p959_p4 = scmp.lt.s32.totalorder %s953_s8, %s953_s8 }
 0x3e1   :  { %p960_p5 = por %p959_p4, %p958_p3 }
 0x3e3   :  { %p961_p6 = pnand %p960_p5, %p954_p2 }
 0x499   :  { %v690_v0 = vpop.f32.mrf.mxu0 }
 0x49a   :  { %v691_v2 = vadd.f32 %v690_v0, %v171_v54 }
 0x49b   :  { %v812_v3 = vpop.f32.mrf.mxu0 }
 0x49c   :  { %831 = vtanh.f32 %v691_v2 }
 0x4a9   :  { %v832_v4 = vpop.eup %831 }
 0x4aa   :  { %696 = vst.msk [vmem:[#allocation11] sm:$0x3] %vm695_vm5, %v832_v4 }
 0x4ab   :  { %964 = shalt.err (!%p961_p6)
}
 0x4ac   :  { %706 = dma.vmem_to_hbm [thread:$0]  %s704_s30, 32, %s1129_s6, [#allocation4]  }
 0x4ad   :  { %979 = dma.done.wait [#allocation4], 32  }
 0x4ae   :  { %980 = vsyncadd [#allocation4], 4294967264 }
 0x4af   :  { %981 = dma.done.wait [#allocation13], 32  }
 0x4b0   :  { %982 = vsyncadd [#allocation13], 4294967264 }
 0x4b1   :  { %723 = vsyncpa [#allocation3], 1 }
 0x4b2   :  { %724 = vsyncpa [#allocation6], 1 }
 0x4b3   :  { %725 = vsyncpa [#allocation9], 1 }
 0x4b4   :  { %726 = vsyncpa [#allocation4], 1 }
 0x4b5   :  { %727 = vsyncpa [#allocation13], 1 }

</bundles_post_ra>
